<compile_context>
chip_gen: v5e
topology: v5e:2x2
jax: 0.10.0
libtpu: 0.0.40
codegen_flags: <defaults>
</compile_context>

<pallas_src>
import jax
import jax.numpy as jnp
from jax.experimental import pallas as pl
from jax.experimental.pallas import tpu as pltpu


def observer_qparams_kernel(scale_ref, zp_ref):
    # qparams set by Observer.forward(): scale = [2.0], zero_point = [3]
    # Single invocation (no grid), SMEM scalar outputs -> two scalar stores.
    scale_ref[0] = jnp.float32(2.0)
    zp_ref[0] = jnp.int32(3)


def _emit_qparams():
    return pl.pallas_call(
        observer_qparams_kernel,
        out_shape=(
            jax.ShapeDtypeStruct((1,), jnp.float32),
            jax.ShapeDtypeStruct((1,), jnp.int32),
        ),
        out_specs=(
            pl.BlockSpec(memory_space=pltpu.MemorySpace.SMEM),
            pl.BlockSpec(memory_space=pltpu.MemorySpace.SMEM),
        ),
        # Tell XLA this call is near-free (8 bytes written, no flops) so it
        # never serializes real work around the opaque custom call.
        cost_estimate=pl.CostEstimate(flops=0, transcendentals=0, bytes_accessed=8),
    )()


@jax.jit
def observer_forward(x):
    """Observer.forward: returns (x, scale, zero_point) with x untouched."""
    scale, zp = _emit_qparams()
    # Identity pass-through: zero HBM traffic, the same array is returned.
    return x, scale, zp


def calculate_qparams(scale, zero_point):
    # mirrors Observer.calculate_qparams()
    return scale, zero_point


if __name__ == "__main__":
    key = jax.random.PRNGKey(0)
    # small NCHW input consistent with a quantization-observer pass
    x = jax.random.normal(key, (2, 4, 16, 16), dtype=jnp.float32)

    y, scale, zp = observer_forward(x)
    jax.block_until_ready((y, scale, zp))

    # forward is an identity; qparams are the constants set in forward()
    assert y.shape == x.shape and y.dtype == x.dtype
    assert jnp.allclose(y, x)
    s, z = calculate_qparams(scale, zp)
    assert jnp.allclose(s, jnp.array([2.0], dtype=jnp.float32))
    assert jnp.array_equal(z, jnp.array([3], dtype=jnp.int32))

    print("KERNEL_OK")
</pallas_src>

<mosaic_0001>
module attributes {stable_mosaic.version = 11 : i64} {
  func.func @observer_qparams_kernel(%arg0: memref<1xf32, #tpu.memory_space<smem>>, %arg1: memref<1xi32, #tpu.memory_space<smem>>) attributes {dimension_semantics = [], scalar_prefetch = 0 : i64, scratch_operands = 0 : i64, tpu.core_type = #tpu.core_type<tc>} {
    %cst = arith.constant 2.000000e+00 : f32
    %c0 = arith.constant 0 : index
    %0 = memref.load %arg0[%c0] : memref<1xf32, #tpu.memory_space<smem>>
    memref.store %cst, %arg0[%c0] : memref<1xf32, #tpu.memory_space<smem>>
    %c3_i32 = arith.constant 3 : i32
    %c0_0 = arith.constant 0 : index
    %1 = memref.load %arg1[%c0_0] : memref<1xi32, #tpu.memory_space<smem>>
    memref.store %c3_i32, %arg1[%c0_0] : memref<1xi32, #tpu.memory_space<smem>>
    return
  }
}

</mosaic_0001>

<bundles_post_ra>
// kernel: observer_forward.1
= control target key start
LH: loop header
LB: loop body
LE: loop exit
PB: predicated region body
PF: predicated region fallthrough
CT: control target
= control target key end

     0   :  { %7 = vsyncpa [#allocation3], 0  ;;  %s94_s0 = inlined_call_operand.hbm [shape: f32[1], index: 0, kind: output, shape index: {0}]   ;;  %s95_s1 = inlined_call_operand.hbm [shape: s32[1], index: 1, kind: output, shape index: {1}]  }
   0x1   :  { %s18_s8 = sshll.u32 %s94_s0, 4  ;;  %s19_s8 = int_to_ptr.hbm [resolvable:$true] %s18_s8 }
   0x2   :  { %8 = vsyncpa [#allocation5], 0  ;;  %s74_s9 = smov 2.0   ;;  %s75_s10 = smov [#allocation2]  }
   0x3   :  { %10 = sst [smem:[#allocation2]] %s74_s9  ;;  %s76_s11 = smov 3  }
   0x4   :  { %21 = dma.smem_to_hbm %s75_s10, 16, %s19_s8, [#allocation3]  }
   0x5   :  { %12 = sst [smem:[#allocation4]] %s76_s11  ;;  %s27_s14 = sshll.u32 %s95_s1, 4  ;;  %s28_s14 = int_to_ptr.hbm [resolvable:$true] %s27_s14 }
   0x6   :  { %s77_s15 = smov [#allocation4]  }
   0x7   :  { %30 = dma.smem_to_hbm %s77_s15, 16, %s28_s14, [#allocation5]  }
   0x8   :  { %70 = dma.done.wait [#allocation3], 16  }
   0x9   :  { %71 = vsyncadd [#allocation3], 4294967280 }
   0xa   :  { %72 = dma.done.wait [#allocation5], 16  }
   0xb   :  { %73 = vsyncadd [#allocation5], 4294967280 }
   0xc   :  { %39 = sfence }
   0xd   :  { %40 = vsyncpa [#allocation3], 1 }
   0xe   :  { %41 = vsyncpa [#allocation5], 1 }

</bundles_post_ra>
